<compile_context>
chip_gen: v6e
topology: v6e:2x2x1
jax: 0.10.0
libtpu: 0.0.40
codegen_flags: <defaults>
</compile_context>

<pallas_src>
import functools

import jax
import jax.numpy as jnp
from jax.experimental import pallas as pl
from jax.experimental.pallas import tpu as pltpu

CLAMP = 10.0
_SMALL_BATCH_THRESHOLD = 1024  # below this, the fused XLA path beats kernel launch overhead


# ---------------------------------------------------------------------------
# Kernel
# ---------------------------------------------------------------------------
def _mlp_clamp_kernel(x_ref, w1_ref, b1_ref, w2_ref, b2_ref, w3_ref, b3_ref, o_ref):
    """clamp(relu(relu(x@W1+b1)@W2+b2)@W3 + b3_eff, -10, 10) for one batch tile.

    b3_ref already holds (b3 - net(target)), so no per-tile subtraction is needed.
    Matmuls accumulate in f32 on the MXU; bias add / ReLU / clamp stay in f32 on
    the VPU (v5e's VPU has no bf16, so elementwise work is f32 everywhere).
    """
    wdt = w1_ref.dtype
    h = jnp.dot(x_ref[...], w1_ref[...], preferred_element_type=jnp.float32)
    h = jnp.maximum(h + b1_ref[...], 0.0)
    h = jnp.dot(h.astype(wdt), w2_ref[...], preferred_element_type=jnp.float32)
    h = jnp.maximum(h + b2_ref[...], 0.0)
    y = jnp.dot(h.astype(wdt), w3_ref[...], preferred_element_type=jnp.float32) + b3_ref[...]
    o_ref[...] = jnp.clip(y, -CLAMP, CLAMP).astype(o_ref.dtype)


# ---------------------------------------------------------------------------
# Helpers
# ---------------------------------------------------------------------------
def _mlp_jax(v, params):
    """Pure-JAX MLP (used for the one-off net(target) precompute and as reference)."""
    h1 = jnp.maximum(v @ params["w1"] + params["b1"], 0.0)
    h2 = jnp.maximum(h1 @ params["w2"] + params["b2"], 0.0)
    return h2 @ params["w3"] + params["b3"]


def _round_up(x, m):
    return (x + m - 1) // m * m


def _pick_batch_tile(B):
    """Largest preferred tile that still yields >= 2 grid steps (v7x megacore).

    With 32-wide features the kernel is per-step-overhead / DMA bound, so big
    tiles are strictly better; tiny batches collapse to one sublane-aligned block.
    """
    for tb in (4096, 2048, 1024, 512, 256, 128):
        if B >= 2 * tb:
            return tb
    return _round_up(max(B, 8), 8)


# ---------------------------------------------------------------------------
# Pallas wrapper
# ---------------------------------------------------------------------------
@functools.partial(jax.jit, static_argnames=("compute_dtype",))
def control_pgd_nlc_net_pallas(x, b3_eff, params, compute_dtype=jnp.float32):
    """x: [B, n_in]; b3_eff: [1, n_out] = b3 - net(target) (precomputed once)."""
    B, n_in = x.shape
    n_hid = params["w1"].shape[1]
    n_out = params["w3"].shape[1]

    # Storage dtype for the batch-scaled HBM stream (x) and the weights; biases,
    # accumulation and all elementwise work stay f32.
    xk = x.astype(compute_dtype)
    w1 = params["w1"].astype(compute_dtype)
    w2 = params["w2"].astype(compute_dtype)
    w3 = params["w3"].astype(compute_dtype)
    b1 = params["b1"].astype(jnp.float32)
    b2 = params["b2"].astype(jnp.float32)
    b3 = b3_eff.astype(jnp.float32)

    tb = _pick_batch_tile(B)
    B_pad = _round_up(B, tb)
    if B_pad != B:
        # Zero-pad the tail tile; padded rows are sliced off below, never visible.
        xk = jnp.pad(xk, ((0, B_pad - B), (0, 0)))
    grid = (B_pad // tb,)

    # VMEM budget: 2x double-buffered (x tile + out tile) + resident weights/biases,
    # with generous headroom; well under v7x's 64 MiB physical VMEM.
    itm = jnp.dtype(compute_dtype).itemsize
    w_bytes = (n_in * n_hid + n_hid * n_hid + n_hid * n_out) * itm + (2 * n_hid + n_out) * 4
    io_bytes = 2 * (tb * n_in * itm + tb * n_out * 4)
    vmem_limit = min(max(2 * (w_bytes + io_bytes), 16 << 20), 64 << 20)

    # Batch-tiled x / out; weights and biases are a single replicated block that
    # stays resident in VMEM across the whole grid.
    x_spec = pl.BlockSpec((tb, n_in), lambda i: (i, 0))
    out_spec = pl.BlockSpec((tb, n_out), lambda i: (i, 0))
    w1_spec = pl.BlockSpec((n_in, n_hid), lambda i: (0, 0))
    b1_spec = pl.BlockSpec((1, n_hid), lambda i: (0, 0))
    w2_spec = pl.BlockSpec((n_hid, n_hid), lambda i: (0, 0))
    b2_spec = pl.BlockSpec((1, n_hid), lambda i: (0, 0))
    w3_spec = pl.BlockSpec((n_hid, n_out), lambda i: (0, 0))
    b3_spec = pl.BlockSpec((1, n_out), lambda i: (0, 0))

    out_pad = pl.pallas_call(
        _mlp_clamp_kernel,
        out_shape=jax.ShapeDtypeStruct((B_pad, n_out), jnp.float32),
        grid=grid,
        in_specs=[x_spec, w1_spec, b1_spec, w2_spec, b2_spec, w3_spec, b3_spec],
        out_specs=out_spec,
        compiler_params=pltpu.CompilerParams(
            dimension_semantics=("parallel",),   # shards batch tiles across TCs on v7x
            vmem_limit_bytes=int(vmem_limit)),
    )(xk, w1, b1, w2, b2, w3, b3)

    return out_pad[:B]

    # TODO(synk): if bundle dumps ever show the vst slot binding on the narrow
    # (tb, n_out) masked stores, pack rows into a lane-dense (tb/16, 128) slab
    # in-kernel instead of padding n_out in HBM.


# ---------------------------------------------------------------------------
# Module-level forward (binds params + target once, like the nn.Module)
# ---------------------------------------------------------------------------
def make_forward(params, target_row, compute_dtype=jnp.float32):
    """Return forward(x).  net(target) is precomputed ONCE and folded into b3."""
    target_out = _mlp_jax(target_row, params)          # [1, n_out], x-independent
    b3_eff = params["b3"] - target_out                 # folded last-layer bias

    @jax.jit
    def _small_batch(x):                               # XLA path: launch-overhead free
        return jnp.clip(_mlp_jax(x, params) - target_out, -CLAMP, CLAMP)

    def forward(x):
        if x.shape[0] < _SMALL_BATCH_THRESHOLD:
            return _small_batch(x)
        return control_pgd_nlc_net_pallas(x, b3_eff, params, compute_dtype=compute_dtype)

    forward.b3_eff = b3_eff
    forward.target_out = target_out
    return forward


def init_params(key, n_input, n_hidden, n_output):
    """Deterministic synthetic parameter init (PyTorch-Linear-like uniform)."""
    ks = jax.random.split(key, 6)

    def lin(kw, kb, fan_in, fan_out):
        bound = 1.0 / jnp.sqrt(fan_in)
        w = jax.random.uniform(kw, (fan_in, fan_out), jnp.float32, -bound, bound)
        b = jax.random.uniform(kb, (1, fan_out), jnp.float32, -bound, bound)
        return w, b

    w1, b1 = lin(ks[0], ks[1], n_input, n_hidden)
    w2, b2 = lin(ks[2], ks[3], n_hidden, n_hidden)
    w3, b3 = lin(ks[4], ks[5], n_hidden, n_output)
    return {"w1": w1, "b1": b1, "w2": w2, "b2": b2, "w3": w3, "b3": b3}


if __name__ == "__main__":
    n_input, n_hidden, n_output = 32, 32, 8

    key = jax.random.PRNGKey(0)
    k_params, k_x, k_t, k_x2 = jax.random.split(key, 4)

    params = init_params(k_params, n_input, n_hidden, n_output)
    # TODO(synk): synthetic stand-in for np.load('./data/target_100.npy').view([1, -1]).
    target_row = jax.random.normal(k_t, (1, n_input), jnp.float32)

    fwd = make_forward(params, target_row)  # precomputes b3_eff = b3 - net(target) once

    def reference(x):
        return jnp.clip(
            _mlp_jax(x, params)
            - _mlp_jax(jnp.broadcast_to(target_row, (x.shape[0], n_input)), params),
            -CLAMP, CLAMP)

    # --- Check 1: small batch, force the Pallas kernel (single padded block) ---
    batch = 8
    x = jax.random.normal(k_x, (batch, n_input), jnp.float32)
    out = control_pgd_nlc_net_pallas(x, fwd.b3_eff, params)
    jax.block_until_ready(out)
    assert out.shape == (batch, n_output)
    assert jnp.allclose(out, reference(x), atol=1e-5, rtol=1e-5)

    # --- Check 2: non-divisible batch -> cdiv grid (3 steps) + padded tail ---
    batch2 = 300
    x2 = jax.random.normal(k_x2, (batch2, n_input), jnp.float32)
    out2 = control_pgd_nlc_net_pallas(x2, fwd.b3_eff, params)
    jax.block_until_ready(out2)
    assert out2.shape == (batch2, n_output)
    assert jnp.allclose(out2, reference(x2), atol=1e-5, rtol=1e-5)

    # --- Check 3: module-level forward() (small-batch XLA fallback path) ---
    out3 = fwd(x)
    jax.block_until_ready(out3)
    assert jnp.allclose(out3, reference(x), atol=1e-5, rtol=1e-5)

    print("KERNEL_OK")
</pallas_src>

<mosaic_0001>
module attributes {stable_mosaic.version = 11 : i64} {
  func.func @_mlp_clamp_kernel(%arg0: i32, %arg1: memref<8x32xf32, #tpu.memory_space<vmem>>, %arg2: memref<32x32xf32, #tpu.memory_space<vmem>>, %arg3: memref<1x32xf32, #tpu.memory_space<vmem>>, %arg4: memref<32x32xf32, #tpu.memory_space<vmem>>, %arg5: memref<1x32xf32, #tpu.memory_space<vmem>>, %arg6: memref<32x8xf32, #tpu.memory_space<vmem>>, %arg7: memref<1x8xf32, #tpu.memory_space<vmem>>, %arg8: memref<8x8xf32, #tpu.memory_space<vmem>>) attributes {dimension_semantics = [#tpu.dimension_semantics<parallel>], iteration_bounds = array<i64: 1>, scalar_prefetch = 0 : i64, scratch_operands = 0 : i64, tpu.core_type = #tpu.core_type<tc>, window_params = [{transform_indices = @transform_0, window_bounds = array<i64: 8, 32>}, {pipeline_mode = #tpu.pipeline_mode<synchronous>, transform_indices = @transform_1, window_bounds = array<i64: 32, 32>}, {pipeline_mode = #tpu.pipeline_mode<synchronous>, transform_indices = @transform_2, window_bounds = array<i64: 1, 32>}, {pipeline_mode = #tpu.pipeline_mode<synchronous>, transform_indices = @transform_3, window_bounds = array<i64: 32, 32>}, {pipeline_mode = #tpu.pipeline_mode<synchronous>, transform_indices = @transform_4, window_bounds = array<i64: 1, 32>}, {pipeline_mode = #tpu.pipeline_mode<synchronous>, transform_indices = @transform_5, window_bounds = array<i64: 32, 8>}, {pipeline_mode = #tpu.pipeline_mode<synchronous>, transform_indices = @transform_6, window_bounds = array<i64: 1, 8>}, {transform_indices = @transform_7, window_bounds = array<i64: 8, 8>}]} {
    %c0 = arith.constant 0 : index
    %c0_0 = arith.constant 0 : index
    %0 = vector.load %arg1[%c0, %c0_0] : memref<8x32xf32, #tpu.memory_space<vmem>>, vector<8x32xf32>
    %c0_1 = arith.constant 0 : index
    %c0_2 = arith.constant 0 : index
    %1 = vector.load %arg2[%c0_1, %c0_2] : memref<32x32xf32, #tpu.memory_space<vmem>>, vector<32x32xf32>
    %cst = arith.constant dense<0.000000e+00> : vector<8x32xf32>
    %2 = tpu.matmul %0, %1, %cst {dimension_numbers = #tpu.dot_dimension_numbers<[1], [0], [0], [1], [0, 0, 1, 1], [], []>} : vector<8x32xf32>, vector<32x32xf32>, vector<8x32xf32> -> vector<8x32xf32>
    %c0_3 = arith.constant 0 : index
    %c0_4 = arith.constant 0 : index
    %3 = vector.load %arg3[%c0_3, %c0_4] : memref<1x32xf32, #tpu.memory_space<vmem>>, vector<1x32xf32>
    %4 = vector.broadcast %3 : vector<1x32xf32> to vector<8x32xf32>
    %5 = arith.addf %2, %4 : vector<8x32xf32>
    %cst_5 = arith.constant 0.000000e+00 : f32
    %6 = vector.broadcast %cst_5 : f32 to vector<8x32xf32>
    %7 = arith.maximumf %5, %6 : vector<8x32xf32>
    %c0_6 = arith.constant 0 : index
    %c0_7 = arith.constant 0 : index
    %8 = vector.load %arg4[%c0_6, %c0_7] : memref<32x32xf32, #tpu.memory_space<vmem>>, vector<32x32xf32>
    %cst_8 = arith.constant dense<0.000000e+00> : vector<8x32xf32>
    %9 = tpu.matmul %7, %8, %cst_8 {dimension_numbers = #tpu.dot_dimension_numbers<[1], [0], [0], [1], [0, 0, 1, 1], [], []>} : vector<8x32xf32>, vector<32x32xf32>, vector<8x32xf32> -> vector<8x32xf32>
    %c0_9 = arith.constant 0 : index
    %c0_10 = arith.constant 0 : index
    %10 = vector.load %arg5[%c0_9, %c0_10] : memref<1x32xf32, #tpu.memory_space<vmem>>, vector<1x32xf32>
    %11 = vector.broadcast %10 : vector<1x32xf32> to vector<8x32xf32>
    %12 = arith.addf %9, %11 : vector<8x32xf32>
    %cst_11 = arith.constant 0.000000e+00 : f32
    %13 = vector.broadcast %cst_11 : f32 to vector<8x32xf32>
    %14 = arith.maximumf %12, %13 : vector<8x32xf32>
    %c0_12 = arith.constant 0 : index
    %c0_13 = arith.constant 0 : index
    %15 = vector.load %arg6[%c0_12, %c0_13] : memref<32x8xf32, #tpu.memory_space<vmem>>, vector<32x8xf32>
    %cst_14 = arith.constant dense<0.000000e+00> : vector<8x8xf32>
    %16 = tpu.matmul %14, %15, %cst_14 {dimension_numbers = #tpu.dot_dimension_numbers<[1], [0], [0], [1], [0, 0, 1, 1], [], []>} : vector<8x32xf32>, vector<32x8xf32>, vector<8x8xf32> -> vector<8x8xf32>
    %c0_15 = arith.constant 0 : index
    %c0_16 = arith.constant 0 : index
    %17 = vector.load %arg7[%c0_15, %c0_16] : memref<1x8xf32, #tpu.memory_space<vmem>>, vector<1x8xf32>
    %18 = vector.broadcast %17 : vector<1x8xf32> to vector<8x8xf32>
    %19 = arith.addf %16, %18 : vector<8x8xf32>
    %cst_17 = arith.constant -1.000000e+01 : f32
    %cst_18 = arith.constant 1.000000e+01 : f32
    %20 = vector.broadcast %cst_17 : f32 to vector<8x8xf32>
    %21 = arith.maximumf %20, %19 : vector<8x8xf32>
    %22 = vector.broadcast %cst_18 : f32 to vector<8x8xf32>
    %23 = arith.minimumf %22, %21 : vector<8x8xf32>
    %c0_19 = arith.constant 0 : index
    %c0_20 = arith.constant 0 : index
    %24 = vector.load %arg8[%c0_19, %c0_20] : memref<8x8xf32, #tpu.memory_space<vmem>>, vector<8x8xf32>
    tpu.vector_store %arg8[%c0_19, %c0_20], %23 {strides = array<i32>} : memref<8x8xf32, #tpu.memory_space<vmem>>, vector<8x8xf32>,
    return
  }
  func.func @transform_0(%arg0: i32) -> (i32, i32) {
    %c0_i32 = arith.constant 0 : i32
    %c0_i32_0 = arith.constant 0 : i32
    return %arg0, %c0_i32 : i32, i32
  }
  func.func @transform_1(%arg0: i32) -> (i32, i32) {
    %c0_i32 = arith.constant 0 : i32
    %c0_i32_0 = arith.constant 0 : i32
    %c0_i32_1 = arith.constant 0 : i32
    return %c0_i32, %c0_i32_0 : i32, i32
  }
  func.func @transform_2(%arg0: i32) -> (i32, i32) {
    %c0_i32 = arith.constant 0 : i32
    %c0_i32_0 = arith.constant 0 : i32
    %c0_i32_1 = arith.constant 0 : i32
    return %c0_i32, %c0_i32_0 : i32, i32
  }
  func.func @transform_3(%arg0: i32) -> (i32, i32) {
    %c0_i32 = arith.constant 0 : i32
    %c0_i32_0 = arith.constant 0 : i32
    %c0_i32_1 = arith.constant 0 : i32
    return %c0_i32, %c0_i32_0 : i32, i32
  }
  func.func @transform_4(%arg0: i32) -> (i32, i32) {
    %c0_i32 = arith.constant 0 : i32
    %c0_i32_0 = arith.constant 0 : i32
    %c0_i32_1 = arith.constant 0 : i32
    return %c0_i32, %c0_i32_0 : i32, i32
  }
  func.func @transform_5(%arg0: i32) -> (i32, i32) {
    %c0_i32 = arith.constant 0 : i32
    %c0_i32_0 = arith.constant 0 : i32
    %c0_i32_1 = arith.constant 0 : i32
    return %c0_i32, %c0_i32_0 : i32, i32
  }
  func.func @transform_6(%arg0: i32) -> (i32, i32) {
    %c0_i32 = arith.constant 0 : i32
    %c0_i32_0 = arith.constant 0 : i32
    %c0_i32_1 = arith.constant 0 : i32
    return %c0_i32, %c0_i32_0 : i32, i32
  }
  func.func @transform_7(%arg0: i32) -> (i32, i32) {
    %c0_i32 = arith.constant 0 : i32
    %c0_i32_0 = arith.constant 0 : i32
    return %arg0, %c0_i32 : i32, i32
  }
}

</mosaic_0001>

<bundles_post_ra>
// kernel: control_pgd_nlc_net_pallas.1
= control target key start
LH: loop header
LB: loop body
LE: loop exit
PB: predicated region body
PF: predicated region fallthrough
CT: control target
= control target key end

     0   :  { %12 = vsyncpa [#allocation3], 0  ;;  %s552_s0 = inlined_call_operand.vmem [shape: f32[8,32], index: 0, kind: input, shape index: {}]   ;;  %s553_s1 = inlined_call_operand.vmem [shape: f32[32,32], index: 1, kind: input, shape index: {}]   ;;  %s554_s2 = inlined_call_operand.vmem [shape: f32[1,32], index: 2, kind: input, shape index: {}]   ;;  %s555_s3 = inlined_call_operand.hbm [shape: f32[32,32], index: 3, kind: input, shape index: {}]   ;;  %s556_s4 = inlined_call_operand.vmem [shape: f32[1,32], index: 4, kind: input, shape index: {}]   ;;  %s557_s5 = inlined_call_operand.vmem [shape: f32[32,8], index: 5, kind: input, shape index: {}]   ;;  %s558_s6 = inlined_call_operand.hbm [shape: f32[1,8], index: 6, kind: input, shape index: {}]   ;;  %s559_s7 = inlined_call_operand.hbm [shape: f32[8,8], index: 7, kind: output, shape index: {}]  }
   0x1   :  { %13 = vsyncpa [#allocation6], 0 }
   0x2   :  { %14 = vsyncpa [#allocation4], 0  ;;  %s457_s24 = smov [#allocation2]  }
   0x3   :  { %s26_s25 = sshll.u32 %s457_s24, 4  ;;  %s27_s25 = int_to_ptr.vmem [resolvable:$true] %s26_s25 }
   0x4   :  { %s399_s26 = scalar_lea.vmem %s27_s25, 512  ;;  %p404_p1 = scmp.lt.s32.totalorder %s27_s25, %s27_s25 }
   0x5   :  { %p400_p0 = scmp.ne.s32.totalorder %s27_s25, %s399_s26  ;;  %p405_p2 = scmp.lt.s32.totalorder %s399_s26, %s399_s26 }
   0x7   :  { %p406_p3 = por %p405_p2, %p404_p1 }
   0x9   :  { %p407_p4 = pnand %p406_p3, %p400_p0 }
   0xb   :  { %410 = shalt.err (!%p407_p4)
}
   0xc   :  { %s458_s27 = smov 128   ;;  %s459_s28 = smov 8  }
   0xd   :  { %32 = dma.hbm_to_vmem [thread:$0]  %s555_s3, 512, %s27_s25, [#allocation3], %s458_s27, %s458_s27, %s459_s28  }
   0xe   :  { %s460_s8 = smov [#allocation5]  }
   0xf   :  { %s43_s9 = sshll.u32 %s460_s8, 4  ;;  %s44_s9 = int_to_ptr.vmem [resolvable:$true] %s43_s9 }
  0x10   :  { %s419_s10 = scalar_lea.vmem %s44_s9, 16  ;;  %s423_s11 = scalar_lea.vmem %s44_s9, 32 }
  0x11   :  { %p420_p5 = scmp.ne.s32.totalorder %s44_s9, %s419_s10  ;;  %p424_p6 = scmp.lt.s32.totalorder %s44_s9, %s44_s9 }
  0x12   :  { %p425_p7 = scmp.lt.s32.totalorder %s423_s11, %s419_s10 }
  0x14   :  { %p426_p8 = por %p425_p7, %p424_p6 }
  0x16   :  { %p427_p9 = pnand %p426_p8, %p420_p5 }
  0x18   :  { %430 = shalt.err (!%p427_p9)
}
  0x19   :  { %46 = dma.hbm_to_vmem [thread:$0]  %s558_s6, 16, %s44_s9, [#allocation6]  }
  0x1a   :  { %451 = dma.done.wait [#allocation3], 512  }
  0x1b   :  { %452 = vsyncadd [#allocation3], 4294966784 }
  0x1c   :  { %453 = dma.done.wait [#allocation6], 16  }
  0x1d   :  { %454 = vsyncadd [#allocation6], 4294967280  ;;  %v461_v0 = vmov 0.0   ;;  %vm462_vm0 = vmmov 0   ;;  %v57_v1 = vld [vmem:[%s553_s1 + $0x18] sm:$0xff]  ;;  %v56_v2 = vld [vmem:[%s553_s1 + $0x10] sm:$0xff] }
  0x1e   :  { %351 = vmatprep.subr.mxu0 %v461_v0  ;;  %359 = vmatprep.mubr.msk.f32.mxu0 %vm462_vm0, %v461_v0  ;;  %v143_v3 = vld [vmem:[#allocation2 + $0x18] sm:$0xff]  ;;  %v55_v4 = vld [vmem:[%s553_s1 + $0x8] sm:$0xff]  ;;  %v54_v5 = vld [vmem:[%s553_s1] sm:$0xff]  ;;  %vm65_vm1 = vcmask 261120   ;;  %s463_s8 = smov [#allocation7]   ;;  %vm311_vm2 = vcmask 64512  }
  0x1f   :  { %362 = vmatprep.subr.mxu1 %v461_v0  ;;  %370 = vmatprep.mubr.msk.f32.mxu1 %vm462_vm0, %v461_v0  ;;  %v53_v6 = vld [vmem:[%s552_s0] sm:$0xff]  ;;  %v142_v7 = vld [vmem:[#allocation2 + $0x10] sm:$0xff]  ;;  %v141_v8 = vld [vmem:[#allocation2 + $0x8] sm:$0xff]  ;;  %s319_s9 = sshll.u32 %s463_s8, 4  ;;  %s320_s9 = int_to_ptr.vmem [resolvable:$true] %s319_s9 }
  0x20   :  { %352 = vmatpush3.msra.mxu0 %v57_v1  ;;  %363 = vmatpush3.msra.mxu1 %v143_v3  ;;  %v140_v9 = vld [vmem:[#allocation2] sm:$0xff]  ;;  %v228_v10 = vld [vmem:[%s557_s5 + $0x18] sm:$0xff]  ;;  %v227_v16 = vld [vmem:[%s557_s5 + $0x10] sm:$0xff]  ;;  %p436_p11 = scmp.lt.s32.totalorder %s320_s9, %s320_s9 }
  0x21   :  { %353 = vmatprep.subr.mxu0 %v461_v0  ;;  %364 = vmatprep.subr.mxu1 %v461_v0  ;;  %v329_v11 = vld [vmem:[%s554_s2] ss:$0 sm:$0xff]  ;;  %v226_v17 = vld [vmem:[%s557_s5 + $0x8] sm:$0xff] }
  0x22   :  { %354 = vmatpush3.msra.mxu0 %v56_v2  ;;  %365 = vmatpush3.msra.mxu1 %v142_v7  ;;  %v225_v18 = vld [vmem:[%s557_s5] sm:$0xff]  ;;  %s431_s5 = scalar_lea.vmem %s320_s9, 128 }
  0x23   :  { %355 = vmatprep.subr.mxu0 %v461_v0  ;;  %366 = vmatprep.subr.mxu1 %v461_v0  ;;  %v331_v19 = vld [vmem:[%s556_s4] ss:$0 sm:$0xff]  ;;  %p432_p10 = scmp.ne.s32.totalorder %s320_s9, %s431_s5  ;;  %p437_p12 = scmp.lt.s32.totalorder %s431_s5, %s431_s5 }
  0x24   :  { %356 = vmatpush3.msra.mxu0 %v55_v4  ;;  %367 = vmatpush3.msra.mxu1 %v141_v8  ;;  %v333_v24 = vld [vmem:[#allocation5] ss:$0 sm:$0xff] }
  0x25   :  { %357 = vmatprep.subr.mxu0 %v461_v0  ;;  %368 = vmatprep.subr.mxu1 %v461_v0  ;;  %p438_p13 = por %p437_p12, %p436_p11 }
  0x26   :  { %358 = vmatpush3.msra.mxu0 %v54_v5  ;;  %369 = vmatpush3.msra.mxu1 %v140_v9 }
  0x27   :  { %360 = vmatmul.mubr.msk.f32.vlgmr.msra.gmra.mxu0 %vm65_vm1, %v53_v6  ;;  %373 = vmatprep.subr.mxu0 %v461_v0  ;;  %p439_p0 = pnand %p438_p13, %p432_p10 }
  0x28   :  { %381 = vmatprep.mubr.msk.f32.mxu0 %vm462_vm0, %v461_v0  ;;  %374 = vmatpush3.msra.mxu0 %v228_v10 }
  0x29   :  { %375 = vmatprep.subr.mxu0 %v461_v0 }
  0x2a   :  { %376 = vmatpush3.msra.mxu0 %v227_v16 }
  0x2b   :  { %377 = vmatprep.subr.mxu0 %v461_v0 }
  0x2c   :  { %378 = vmatpush3.msra.mxu0 %v226_v17 }
  0x2d   :  { %379 = vmatprep.subr.mxu0 %v461_v0 }
  0x2e   :  { %380 = vmatpush3.msra.mxu0 %v225_v18 }
  0xe7   :  { %v135_v12 = vpop.f32.mrf.mxu0 }
  0xe8   :  { %v136_v13 = vadd.f32 %v329_v11, %v135_v12 }
  0xe9   :  { %v361_v14 = vpop.f32.mrf.mxu0 }
  0xea   :  { %v139_v15 = vmax.f32 %v136_v13, 0.0 }
  0xec   :  { %371 = vmatmul.mubr.msk.f32.vlgmr.msra.gmra.mxu1 %vm65_vm1, %v139_v15 }
 0x1ac   :  { %v220_v20 = vpop.f32.mrf.mxu1 }
 0x1ad   :  { %v221_v21 = vadd.f32 %v331_v19, %v220_v20 }
 0x1ae   :  { %v372_v22 = vpop.f32.mrf.mxu1 }
 0x1af   :  { %v224_v23 = vmax.f32 %v221_v21, 0.0 }
 0x1b1   :  { %382 = vmatmul.mubr.msk.f32.vlgmr.msra.gmra.mxu0 %vm65_vm1, %v224_v23 }
 0x271   :  { %v305_v25 = vpop.f32.mrf.mxu0 }
 0x272   :  { %v306_v26 = vadd.f32 %v333_v24, %v305_v25 }
 0x273   :  { %v383_v27 = vpop.f32.mrf.mxu0 }
 0x274   :  { %v335_v28 = vclamps-f32 %v306_v26, 10.0 }
 0x276   :  { %312 = vst.msk [vmem:[#allocation7] sm:$0xff] %vm311_vm2, %v335_v28 }
 0x277   :  { %442 = shalt.err (!%p439_p0)
}
 0x278   :  { %322 = dma.vmem_to_hbm [thread:$0]  %s320_s9, 128, %s559_s7, [#allocation4]  }
 0x279   :  { %455 = dma.done.wait [#allocation4], 128  }
 0x27a   :  { %456 = vsyncadd [#allocation4], 4294967168 }
 0x27b   :  { %326 = vsyncpa [#allocation3], 1 }
 0x27c   :  { %327 = vsyncpa [#allocation6], 1 }
 0x27d   :  { %328 = vsyncpa [#allocation4], 1 }

</bundles_post_ra>
